<compile_context>
chip_gen: v6e
topology: v6e:2x2x1
jax: 0.10.0
libtpu: 0.0.40
codegen_flags: <defaults>
</compile_context>

<pallas_src>
import functools

import jax
import jax.numpy as jnp
from jax.experimental import pallas as pl
from jax.experimental.pallas import tpu as pltpu


def _spatial_attention_kernel(x_ref, mask_ref, w_ref, o_ref, *, C, H, W):
    # x_ref:    (block_n, C*HW)  VMEM  -- each channel is a contiguous HW lane slice
    # mask_ref: (4, HW)          VMEM  -- resident lane-only 0/1 edge masks (f32)
    # w_ref:    (18,)            SMEM  -- flat (c, ky, kx) conv weight; c=0 pre-scaled by 1/C
    # o_ref:    (block_n, HW)    VMEM  -- sigmoid attention map
    HW = H * W

    # ---- Channel reduction: single streaming pass, one lane-aligned slice per channel.
    # Sum accumulates in f32 (mean's 1/C is folded into the weights); running max stays
    # in the input dtype (bf16-native VPU on v6e/v7x -> half the VALU/vreg cost there).
    x0 = x_ref[:, pl.ds(0, HW)]
    s_plane = x0.astype(jnp.float32)
    m_plane = x0
    for c in range(1, C):
        xc = x_ref[:, pl.ds(c * HW, HW)]
        s_plane = s_plane + xc.astype(jnp.float32)
        m_plane = jnp.maximum(m_plane, xc)
    m_plane = m_plane.astype(jnp.float32)

    # ---- Lane-only (1, HW) edge masks (broadcast over the batch sublanes).
    mask_xm = mask_ref[0:1, :]   # dx = -1 valid (col >= 1)
    mask_xp = mask_ref[1:2, :]   # dx = +1 valid (col <= W-2)
    mask_ym = mask_ref[2:3, :]   # dy = -1 valid (row >= 1)
    mask_yp = mask_ref[3:4, :]   # dy = +1 valid (row <= H-2)

    def lane_shift(p, s, mask):
        # neighbor[q] = p[q + s] where in-bounds, else 0 (conv zero padding).
        # Static XLU roll + 0/1 mask multiply on the VPU.
        r = pltpu.roll(p, (-s) % HW, axis=1)
        return r * mask

    # Horizontal (dx) shifted variants: 2 rolls per plane, dx=0 is the plane itself.
    hx = []
    for p in (s_plane, m_plane):
        hx.append((lane_shift(p, -1, mask_xm), p, lane_shift(p, +1, mask_xp)))

    def wgt(c, dy, dx):
        # flattened (2, 3, 3) weight: [c, dy+1, dx+1]
        return w_ref[c * 9 + (dy + 1) * 3 + (dx + 1)]

    # Combine over (c, dx) per dy, then one vertical shift+mask per dy != 0
    # (shared across both planes -> only 2 extra rolls).
    # NOTE: the dy shift is an exact multiple of W (column-preserving), so the dx masks
    # applied at the pre-shift positions remain valid 2-D zero padding.  Do not change
    # this if the HW layout ever becomes non-contiguous / padded.
    acc = None
    for dy, ymask in ((-1, mask_ym), (0, None), (1, mask_yp)):
        v = None
        for c in range(2):
            for dx in (-1, 0, 1):
                term = wgt(c, dy, dx) * hx[c][dx + 1]
                v = term if v is None else v + term
        if dy != 0:
            v = lane_shift(v, dy * W, ymask)
        acc = v if acc is None else acc + v

    # Sigmoid epilogue: exp on the EUP, exact reciprocal (approx=True would perturb
    # numerics for no gain -- this kernel is mem-bound, not VALU-bound).
    e = jnp.exp(-acc)
    o_ref[...] = pl.reciprocal(1.0 + e).astype(o_ref.dtype)


def _pick_block_n(N, C, HW, itemsize):
    sub = 8 if itemsize >= 4 else 16            # sublane packing granularity
    per_row = C * HW * itemsize                 # bytes of one batch row of the input block
    # ~8 MiB per input block: double-buffered in + out + temps stay well under the
    # explicit 48 MiB VMEM limit (safe on v7x's 64 MiB physical VMEM, and above the
    # 16/32 MiB scoped defaults on v5e/v6e).
    block_n = max(sub, (8 << 20) // max(per_row, 1))
    # Keep >= 2 grid iterations when N allows, so dimension_semantics=("parallel",)
    # can shard across both v7x TensorCores (harmless single-TC on v5e/v6e).
    if N > 2 * sub:
        half = -(-N // 2)                       # ceil(N/2)
        half = -(-half // sub) * sub            # round up to sublane multiple
        block_n = min(block_n, half)
    block_n = max((block_n // sub) * sub, sub)
    if block_n >= N:
        block_n = N        # full-extent block satisfies the (8,128) constraint for any N
    return block_n


def spatial_attention(x, weight, *, block_n=None):
    """x: (N, C, H, W); weight: (1, 2, 3, 3) -> (N, 1, H, W) attention map."""
    N, C, H, W = x.shape
    HW = H * W
    x_flat = x.reshape(N, C * HW)               # lane-dense 2-D layout (free in HBM)

    # Fold the 1/C mean scale into the avg-channel weights; flatten for SMEM.
    w = weight.reshape(2, 3, 3).astype(jnp.float32)
    w = (w * jnp.array([1.0 / C, 1.0], jnp.float32)[:, None, None]).reshape(18)

    # Precomputed lane-only edge masks (0/1 f32), shape (4, HW):
    # [dx=-1 valid, dx=+1 valid, dy=-1 valid, dy=+1 valid]
    col = jnp.arange(HW, dtype=jnp.int32) % W
    row = jnp.arange(HW, dtype=jnp.int32) // W
    masks = jnp.stack(
        [col >= 1, col <= W - 2, row >= 1, row <= H - 2]
    ).astype(jnp.float32)

    if block_n is None:
        block_n = _pick_block_n(N, C, HW, x.dtype.itemsize)

    kernel = functools.partial(_spatial_attention_kernel, C=C, H=H, W=W)

    out_flat = pl.pallas_call(
        kernel,
        out_shape=jax.ShapeDtypeStruct((N, HW), x.dtype),
        grid=(pl.cdiv(N, block_n),),
        in_specs=[
            pl.BlockSpec((block_n, C * HW), lambda n: (n, 0)),
            pl.BlockSpec((4, HW), lambda n: (0, 0)),          # resident masks
            pl.BlockSpec(memory_space=pltpu.MemorySpace.SMEM),  # (18,) weights
        ],
        out_specs=pl.BlockSpec((block_n, HW), lambda n: (n, 0)),
        compiler_params=pltpu.CompilerParams(
            dimension_semantics=("parallel",),   # batch blocks are independent
            vmem_limit_bytes=48 << 20,           # explicit budget (v7x-safe)
        ),
        cost_estimate=pl.CostEstimate(
            flops=int(N * HW * (2 * C + 40)),
            transcendentals=int(N * HW),
            bytes_accessed=int(N * (C + 1) * HW * x.dtype.itemsize + 4 * HW * 4 + 18 * 4),
        ),
    )(x_flat, masks, w)

    return out_flat.reshape(N, 1, H, W)


def spatial_attention_ref(x, weight):
    """Pure-JAX reference matching the PyTorch forward exactly."""
    avg = jnp.mean(x, axis=1, keepdims=True)
    mx = jnp.max(x, axis=1, keepdims=True)
    s = jnp.concatenate([avg, mx], axis=1)
    y = jax.lax.conv_general_dilated(
        s, weight,
        window_strides=(1, 1),
        padding=((1, 1), (1, 1)),
        dimension_numbers=("NCHW", "OIHW", "NCHW"),
    )
    return jax.nn.sigmoid(y)


if __name__ == "__main__":
    key = jax.random.PRNGKey(0)
    kx, kw = jax.random.split(key)

    # Small shapes consistent with the module: batch=2, channels=4, spatial=16.
    N, C, H, W = 2, 4, 16, 16
    x = jax.random.normal(kx, (N, C, H, W), dtype=jnp.float32)

    # Deterministic synthetic conv weight: nn.Conv2d(2, 1, 3, padding=1, bias=False)
    fan_in = 2 * 3 * 3
    bound = (1.0 / fan_in) ** 0.5
    weight = jax.random.uniform(
        kw, (1, 2, 3, 3), dtype=jnp.float32, minval=-bound, maxval=bound
    )

    out = spatial_attention(x, weight)
    out = jax.block_until_ready(out)

    ref = spatial_attention_ref(x, weight)
    assert out.shape == (N, 1, H, W)
    assert jnp.allclose(out, ref, atol=1e-5, rtol=1e-5)

    print("KERNEL_OK")
</pallas_src>

<mosaic_0001>
module attributes {stable_mosaic.version = 11 : i64} {
  func.func @_spatial_attention_kernel(%arg0: i32, %arg1: memref<2x1024xf32, #tpu.memory_space<vmem>>, %arg2: memref<4x256xf32, #tpu.memory_space<vmem>>, %arg3: memref<18xf32, #tpu.memory_space<smem>>, %arg4: memref<2x256xf32, #tpu.memory_space<vmem>>) attributes {dimension_semantics = [#tpu.dimension_semantics<parallel>], iteration_bounds = array<i64: 1>, scalar_prefetch = 0 : i64, scratch_operands = 0 : i64, tpu.core_type = #tpu.core_type<tc>, window_params = [{transform_indices = @transform_0, window_bounds = array<i64: 2, 1024>}, {pipeline_mode = #tpu.pipeline_mode<synchronous>, transform_indices = @transform_1, window_bounds = array<i64: 4, 256>}, {transform_indices = @transform_2, window_bounds = array<i64: 18>}, {transform_indices = @transform_3, window_bounds = array<i64: 2, 256>}]} {
    %c0 = arith.constant 0 : index
    %c0_0 = arith.constant 0 : index
    %0 = vector.load %arg1[%c0, %c0_0] : memref<2x1024xf32, #tpu.memory_space<vmem>>, vector<2x256xf32>
    %c0_1 = arith.constant 0 : index
    %c256 = arith.constant 256 : index
    %1 = vector.load %arg1[%c0_1, %c256] : memref<2x1024xf32, #tpu.memory_space<vmem>>, vector<2x256xf32>
    %2 = arith.addf %0, %1 : vector<2x256xf32>
    %3 = arith.maximumf %0, %1 : vector<2x256xf32>
    %c0_2 = arith.constant 0 : index
    %c512 = arith.constant 512 : index
    %4 = vector.load %arg1[%c0_2, %c512] : memref<2x1024xf32, #tpu.memory_space<vmem>>, vector<2x256xf32>
    %5 = arith.addf %2, %4 : vector<2x256xf32>
    %6 = arith.maximumf %3, %4 : vector<2x256xf32>
    %c0_3 = arith.constant 0 : index
    %c768 = arith.constant 768 : index
    %7 = vector.load %arg1[%c0_3, %c768] : memref<2x1024xf32, #tpu.memory_space<vmem>>, vector<2x256xf32>
    %8 = arith.addf %5, %7 : vector<2x256xf32>
    %9 = arith.maximumf %6, %7 : vector<2x256xf32>
    %c0_4 = arith.constant 0 : index
    %c0_5 = arith.constant 0 : index
    %10 = vector.load %arg2[%c0_4, %c0_5] : memref<4x256xf32, #tpu.memory_space<vmem>>, vector<1x256xf32>
    %c1 = arith.constant 1 : index
    %c0_6 = arith.constant 0 : index
    %11 = vector.load %arg2[%c1, %c0_6] : memref<4x256xf32, #tpu.memory_space<vmem>>, vector<1x256xf32>
    %c2 = arith.constant 2 : index
    %c0_7 = arith.constant 0 : index
    %12 = vector.load %arg2[%c2, %c0_7] : memref<4x256xf32, #tpu.memory_space<vmem>>, vector<1x256xf32>
    %c3 = arith.constant 3 : index
    %c0_8 = arith.constant 0 : index
    %13 = vector.load %arg2[%c3, %c0_8] : memref<4x256xf32, #tpu.memory_space<vmem>>, vector<1x256xf32>
    %c1_i32 = arith.constant 1 : i32
    %14 = tpu.dynamic_rotate %8 by %c1_i32 dim 1 : vector<2x256xf32>, i32 -> vector<2x256xf32>
    %15 = vector.broadcast %10 : vector<1x256xf32> to vector<2x256xf32>
    %16 = arith.mulf %14, %15 : vector<2x256xf32>
    %c255_i32 = arith.constant 255 : i32
    %17 = tpu.dynamic_rotate %8 by %c255_i32 dim 1 : vector<2x256xf32>, i32 -> vector<2x256xf32>
    %18 = vector.broadcast %11 : vector<1x256xf32> to vector<2x256xf32>
    %19 = arith.mulf %17, %18 : vector<2x256xf32>
    %c1_i32_9 = arith.constant 1 : i32
    %20 = tpu.dynamic_rotate %9 by %c1_i32_9 dim 1 : vector<2x256xf32>, i32 -> vector<2x256xf32>
    %21 = vector.broadcast %10 : vector<1x256xf32> to vector<2x256xf32>
    %22 = arith.mulf %20, %21 : vector<2x256xf32>
    %c255_i32_10 = arith.constant 255 : i32
    %23 = tpu.dynamic_rotate %9 by %c255_i32_10 dim 1 : vector<2x256xf32>, i32 -> vector<2x256xf32>
    %24 = vector.broadcast %11 : vector<1x256xf32> to vector<2x256xf32>
    %25 = arith.mulf %23, %24 : vector<2x256xf32>
    %c0_11 = arith.constant 0 : index
    %26 = memref.load %arg3[%c0_11] : memref<18xf32, #tpu.memory_space<smem>>
    %27 = vector.broadcast %26 : f32 to vector<2x256xf32>
    %28 = arith.mulf %27, %16 : vector<2x256xf32>
    %c1_12 = arith.constant 1 : index
    %29 = memref.load %arg3[%c1_12] : memref<18xf32, #tpu.memory_space<smem>>
    %30 = vector.broadcast %29 : f32 to vector<2x256xf32>
    %31 = arith.mulf %30, %8 : vector<2x256xf32>
    %32 = arith.addf %28, %31 : vector<2x256xf32>
    %c2_13 = arith.constant 2 : index
    %33 = memref.load %arg3[%c2_13] : memref<18xf32, #tpu.memory_space<smem>>
    %34 = vector.broadcast %33 : f32 to vector<2x256xf32>
    %35 = arith.mulf %34, %19 : vector<2x256xf32>
    %36 = arith.addf %32, %35 : vector<2x256xf32>
    %c9 = arith.constant 9 : index
    %37 = memref.load %arg3[%c9] : memref<18xf32, #tpu.memory_space<smem>>
    %38 = vector.broadcast %37 : f32 to vector<2x256xf32>
    %39 = arith.mulf %38, %22 : vector<2x256xf32>
    %40 = arith.addf %36, %39 : vector<2x256xf32>
    %c10 = arith.constant 10 : index
    %41 = memref.load %arg3[%c10] : memref<18xf32, #tpu.memory_space<smem>>
    %42 = vector.broadcast %41 : f32 to vector<2x256xf32>
    %43 = arith.mulf %42, %9 : vector<2x256xf32>
    %44 = arith.addf %40, %43 : vector<2x256xf32>
    %c11 = arith.constant 11 : index
    %45 = memref.load %arg3[%c11] : memref<18xf32, #tpu.memory_space<smem>>
    %46 = vector.broadcast %45 : f32 to vector<2x256xf32>
    %47 = arith.mulf %46, %25 : vector<2x256xf32>
    %48 = arith.addf %44, %47 : vector<2x256xf32>
    %c16_i32 = arith.constant 16 : i32
    %49 = tpu.dynamic_rotate %48 by %c16_i32 dim 1 : vector<2x256xf32>, i32 -> vector<2x256xf32>
    %50 = vector.broadcast %12 : vector<1x256xf32> to vector<2x256xf32>
    %51 = arith.mulf %49, %50 : vector<2x256xf32>
    %c3_14 = arith.constant 3 : index
    %52 = memref.load %arg3[%c3_14] : memref<18xf32, #tpu.memory_space<smem>>
    %53 = vector.broadcast %52 : f32 to vector<2x256xf32>
    %54 = arith.mulf %53, %16 : vector<2x256xf32>
    %c4 = arith.constant 4 : index
    %55 = memref.load %arg3[%c4] : memref<18xf32, #tpu.memory_space<smem>>
    %56 = vector.broadcast %55 : f32 to vector<2x256xf32>
    %57 = arith.mulf %56, %8 : vector<2x256xf32>
    %58 = arith.addf %54, %57 : vector<2x256xf32>
    %c5 = arith.constant 5 : index
    %59 = memref.load %arg3[%c5] : memref<18xf32, #tpu.memory_space<smem>>
    %60 = vector.broadcast %59 : f32 to vector<2x256xf32>
    %61 = arith.mulf %60, %19 : vector<2x256xf32>
    %62 = arith.addf %58, %61 : vector<2x256xf32>
    %c12 = arith.constant 12 : index
    %63 = memref.load %arg3[%c12] : memref<18xf32, #tpu.memory_space<smem>>
    %64 = vector.broadcast %63 : f32 to vector<2x256xf32>
    %65 = arith.mulf %64, %22 : vector<2x256xf32>
    %66 = arith.addf %62, %65 : vector<2x256xf32>
    %c13 = arith.constant 13 : index
    %67 = memref.load %arg3[%c13] : memref<18xf32, #tpu.memory_space<smem>>
    %68 = vector.broadcast %67 : f32 to vector<2x256xf32>
    %69 = arith.mulf %68, %9 : vector<2x256xf32>
    %70 = arith.addf %66, %69 : vector<2x256xf32>
    %c14 = arith.constant 14 : index
    %71 = memref.load %arg3[%c14] : memref<18xf32, #tpu.memory_space<smem>>
    %72 = vector.broadcast %71 : f32 to vector<2x256xf32>
    %73 = arith.mulf %72, %25 : vector<2x256xf32>
    %74 = arith.addf %70, %73 : vector<2x256xf32>
    %75 = arith.addf %51, %74 : vector<2x256xf32>
    %c6 = arith.constant 6 : index
    %76 = memref.load %arg3[%c6] : memref<18xf32, #tpu.memory_space<smem>>
    %77 = vector.broadcast %76 : f32 to vector<2x256xf32>
    %78 = arith.mulf %77, %16 : vector<2x256xf32>
    %c7 = arith.constant 7 : index
    %79 = memref.load %arg3[%c7] : memref<18xf32, #tpu.memory_space<smem>>
    %80 = vector.broadcast %79 : f32 to vector<2x256xf32>
    %81 = arith.mulf %80, %8 : vector<2x256xf32>
    %82 = arith.addf %78, %81 : vector<2x256xf32>
    %c8 = arith.constant 8 : index
    %83 = memref.load %arg3[%c8] : memref<18xf32, #tpu.memory_space<smem>>
    %84 = vector.broadcast %83 : f32 to vector<2x256xf32>
    %85 = arith.mulf %84, %19 : vector<2x256xf32>
    %86 = arith.addf %82, %85 : vector<2x256xf32>
    %c15 = arith.constant 15 : index
    %87 = memref.load %arg3[%c15] : memref<18xf32, #tpu.memory_space<smem>>
    %88 = vector.broadcast %87 : f32 to vector<2x256xf32>
    %89 = arith.mulf %88, %22 : vector<2x256xf32>
    %90 = arith.addf %86, %89 : vector<2x256xf32>
    %c16 = arith.constant 16 : index
    %91 = memref.load %arg3[%c16] : memref<18xf32, #tpu.memory_space<smem>>
    %92 = vector.broadcast %91 : f32 to vector<2x256xf32>
    %93 = arith.mulf %92, %9 : vector<2x256xf32>
    %94 = arith.addf %90, %93 : vector<2x256xf32>
    %c17 = arith.constant 17 : index
    %95 = memref.load %arg3[%c17] : memref<18xf32, #tpu.memory_space<smem>>
    %96 = vector.broadcast %95 : f32 to vector<2x256xf32>
    %97 = arith.mulf %96, %25 : vector<2x256xf32>
    %98 = arith.addf %94, %97 : vector<2x256xf32>
    %c240_i32 = arith.constant 240 : i32
    %99 = tpu.dynamic_rotate %98 by %c240_i32 dim 1 : vector<2x256xf32>, i32 -> vector<2x256xf32>
    %100 = vector.broadcast %13 : vector<1x256xf32> to vector<2x256xf32>
    %101 = arith.mulf %99, %100 : vector<2x256xf32>
    %102 = arith.addf %75, %101 : vector<2x256xf32>
    %cst = arith.constant 0.000000e+00 : f32
    %103 = vector.broadcast %cst : f32 to vector<2x256xf32>
    %104 = arith.subf %103, %102 : vector<2x256xf32>
    %105 = math.exp %104 : vector<2x256xf32>
    %cst_15 = arith.constant 1.000000e+00 : f32
    %106 = vector.broadcast %cst_15 : f32 to vector<2x256xf32>
    %107 = arith.addf %106, %105 : vector<2x256xf32>
    %108 = tpu.reciprocal %107 : vector<2x256xf32> -> vector<2x256xf32>
    %c0_16 = arith.constant 0 : index
    %c0_17 = arith.constant 0 : index
    %109 = vector.load %arg4[%c0_16, %c0_17] : memref<2x256xf32, #tpu.memory_space<vmem>>, vector<2x256xf32>
    tpu.vector_store %arg4[%c0_16, %c0_17], %108 {strides = array<i32>} : memref<2x256xf32, #tpu.memory_space<vmem>>, vector<2x256xf32>,
    return
  }
  func.func @transform_0(%arg0: i32) -> (i32, i32) {
    %c0_i32 = arith.constant 0 : i32
    %c0_i32_0 = arith.constant 0 : i32
    return %arg0, %c0_i32 : i32, i32
  }
  func.func @transform_1(%arg0: i32) -> (i32, i32) {
    %c0_i32 = arith.constant 0 : i32
    %c0_i32_0 = arith.constant 0 : i32
    %c0_i32_1 = arith.constant 0 : i32
    return %c0_i32, %c0_i32_0 : i32, i32
  }
  func.func @transform_2(%arg0: i32) -> i32 {
    %c0_i32 = arith.constant 0 : i32
    %c0_i32_0 = arith.constant 0 : i32
    return %c0_i32 : i32
  }
  func.func @transform_3(%arg0: i32) -> (i32, i32) {
    %c0_i32 = arith.constant 0 : i32
    %c0_i32_0 = arith.constant 0 : i32
    return %arg0, %c0_i32 : i32, i32
  }
}

</mosaic_0001>

<bundles_post_ra>
// kernel: tpu_custom_call.1
= control target key start
LH: loop header
LB: loop body
LE: loop exit
PB: predicated region body
PF: predicated region fallthrough
CT: control target
= control target key end

     0   :  { %8 = vsyncpa [#allocation3], 0  ;;  %s658_s0 = inlined_call_operand.hbm [shape: f32[2,1024], index: 0, kind: input, shape index: {}]   ;;  %s659_s1 = inlined_call_operand.hbm [shape: f32[4,256], index: 1, kind: input, shape index: {}]   ;;  %s660_s2 = inlined_call_operand.vmem [shape: f32[18], index: 2, kind: input, shape index: {}]   ;;  %s661_s3 = inlined_call_operand.hbm [shape: f32[2,256], index: 3, kind: output, shape index: {}]  }
   0x1   :  { %9 = vsyncpa [#allocation7], 0 }
   0x2   :  { %10 = vsyncpa [#allocation5], 0 }
   0x3   :  { %11 = vsyncpa [#allocation4], 0  ;;  %s509_s12 = smov [#allocation2]   ;;  %s510_s14 = smov [#allocation6]  }
   0x4   :  { %s18_s13 = sshll.u32 %s509_s12, 4  ;;  %s28_s15 = sshll.u32 %s510_s14, 4  ;;  %s19_s13 = int_to_ptr.vmem [resolvable:$true] %s18_s13  ;;  %s29_s15 = int_to_ptr.vmem [resolvable:$true] %s28_s15 }
   0x5   :  { %s437_s16 = scalar_lea.vmem %s19_s13, 256  ;;  %p442_p1 = scmp.lt.s32.totalorder %s19_s13, %s19_s13 }
   0x6   :  { %p438_p0 = scmp.ne.s32.totalorder %s19_s13, %s437_s16  ;;  %p443_p2 = scmp.lt.s32.totalorder %s437_s16, %s437_s16 }
   0x8   :  { %p444_p3 = por %p443_p2, %p442_p1 }
   0xa   :  { %p445_p4 = pnand %p444_p3, %p438_p0 }
   0xc   :  { %448 = shalt.err (!%p445_p4)
}
   0xd   :  { %21 = dma.hbm_to_vmem [thread:$0]  %s658_s0, 256, %s19_s13, [#allocation3]  }
   0xe   :  { %s457_s19 = scalar_lea.vmem %s29_s15, 128  ;;  %p462_p6 = scmp.lt.s32.totalorder %s29_s15, %s29_s15 }
   0xf   :  { %p458_p5 = scmp.ne.s32.totalorder %s29_s15, %s457_s19  ;;  %p463_p7 = scmp.lt.s32.totalorder %s457_s19, %s457_s19 }
  0x11   :  { %p464_p8 = por %p463_p7, %p462_p6 }
  0x13   :  { %p465_p9 = pnand %p464_p8, %p458_p5 }
  0x15   :  { %468 = shalt.err (!%p465_p9)
}
  0x16   :  { %31 = dma.hbm_to_vmem [thread:$0]  %s659_s1, 128, %s29_s15, [#allocation7]  }
  0x17   :  { %s38_s24 = sshll.u32 %s660_s2, 4  ;;  %s39_s24 = int_to_ptr.vmem [resolvable:$true] %s38_s24 }
  0x18   :  { %s469_s25 = scalar_lea.vmem %s39_s24, 16  ;;  %p474_p11 = scmp.lt.s32.totalorder %s39_s24, %s39_s24 }
  0x19   :  { %p470_p10 = scmp.ne.s32.totalorder %s39_s24, %s469_s25  ;;  %p475_p12 = scmp.lt.s32.totalorder %s469_s25, %s469_s25 }
  0x1b   :  { %p476_p13 = por %p475_p12, %p474_p11 }
  0x1d   :  { %p477_p0 = pnand %p476_p13, %p470_p10 }
  0x1f   :  { %480 = shalt.err (!%p477_p0)
}
  0x20   :  { %s511_s0 = smov [#allocation8]  }
  0x21   :  { %41 = dma.vmem_to_smem %s39_s24, 16, %s511_s0, [#allocation5]  }
  0x22   :  { %501 = dma.done.wait [#allocation3], 256  }
  0x23   :  { %502 = vsyncadd [#allocation3], 4294967040 }
  0x24   :  { %503 = dma.done.wait [#allocation7], 128  }
  0x25   :  { %504 = vsyncadd [#allocation7], 4294967168 }
  0x26   :  { %505 = dma.done.wait [#allocation5], 16  }
  0x27   :  { %506 = vsyncadd [#allocation5], 4294967280 }
  0x28   :  { %51 = sfence }
  0x29   :  { %v52_v0 = vld [vmem:[#allocation2] sm:$0xf]  ;;  %v53_v1 = vld [vmem:[#allocation2 + $0x4] sm:$0xf]  ;;  %v56_v2 = vld [vmem:[#allocation2 + $0x8] sm:$0xf]  ;;  %v73_v3 = vlaneseq }
  0x2a   :  { %v54_v4 = vadd.f32 %v53_v1, %v52_v0  ;;  %v55_v5 = vmax.f32 %v52_v0, %v53_v1  ;;  %v59_v6 = vld [vmem:[#allocation2 + $0xc] sm:$0xf]  ;;  %v512_v7 = vmov 1983009808   ;;  %s394_s1 = sld [smem:[#allocation8 + $0x1]]  ;;  %s513_s26 = smov 127  }
  0x2b   :  { %v71_v8 = vunpack.c.l.s4 %v512_v7  ;;  %v74_v9 = vshrl.u32 %v73_v3, 7  ;;  %s400_s2 = sld [smem:[#allocation8 + $0x4]]  ;;  %s514_s27 = smov 1   ;;  %v575_v38 = vand.u32 127, %v73_v3 }
  0x2c   :  { %v57_v10 = vadd.f32 %v56_v2, %v54_v4  ;;  %v58_v11 = vmax.f32 %v55_v5, %v56_v2  ;;  %s406_s28 = sld [smem:[#allocation8 + $0x7]]  ;;  %v64_v41 = vld [vmem:[#allocation6 + $0x1] ss:$4 sm:$0x3]  ;;  %s515_s17 = smov 16  }
  0x2d   :  { %v72_v12 = vunpack.c.0.s8 %v71_v8  ;;  %s397_s29 = sld [smem:[#allocation8 + $0xa]]  ;;  %v577_v39 = vsub.s32 0, %v74_v9  ;;  %v579_v40 = vsub.s32 1, %v74_v9  ;;  %v62_v42 = vld [vmem:[#allocation6] ss:$4 sm:$0x3] }
  0x2e   :  { %v60_v13 = vadd.f32 %v59_v6, %v57_v10  ;;  %v61_v14 = vmax.f32 %v58_v11, %v59_v6  ;;  %s409_s30 = sld [smem:[#allocation8 + $0x10]]  ;;  %vm106_vm0 = vcmp.lt.s32.totalorder %v575_v38, 127  ;;  %vm86_vm1 = vcmp.lt.s32.totalorder %v575_v38, 1  ;;  %s516_s18 = smov 112  }
  0x2f   :  { %v75_v15 = vsub.s32 %v72_v12, %v74_v9  ;;  %s403_s4 = sld [smem:[#allocation8 + $0xd]]  ;;  %v113_v45 = vrot.slane %v64_v41, %v577_v39  ;;  %v592_v46 = vrot.slane %v64_v41, %v579_v40  ;;  %v93_v49 = vrot.slane %v62_v42, %v577_v39  ;;  %s517_s19 = smov [#allocation9]  }
  0x30   :  { %v154_v19 = vstv %s394_s1  ;;  %s559_s5 = sld [smem:[#allocation8 + $0x2]]  ;;  %v97_v50 = vrot.slane %v62_v42, %v579_v40  ;;  %vm207_vm2 = vcmp.lt.s32.totalorder %v575_v38, 16  ;;  %vm337_vm3 = vcmp.lt.s32.totalorder %v575_v38, 112  ;;  %s383_s20 = sshll.u32 %s517_s19, 4  ;;  %s384_s20 = int_to_ptr.vmem [resolvable:$true] %s383_s20 }
  0x31   :  { %v76_v16 = vrot.slane %v60_v13, %v75_v15  ;;  %v129_v18 = vrot.slane %v61_v14, %v75_v15  ;;  %v155_v21 = vmul.f32 %v154_v19, %v60_v13  ;;  %v228_v22 = vstv %s400_s2  ;;  %s561_s6 = sld [smem:[#allocation8 + $0x5]]  ;;  %s481_s21 = scalar_lea.vmem %s384_s20, 64 }
  0x32   :  { %v229_v24 = vmul.f32 %v228_v22, %v60_v13  ;;  %v284_v25 = vstv %s406_s28  ;;  %s563_s7 = sld [smem:[#allocation8 + $0x8]]  ;;  %p482_p1 = scmp.ne.s32.totalorder %s384_s20, %s481_s21 }
  0x33   :  { %102 = vrot.lane.b32.xlu1 %v76_v16, %s513_s26  ;;  %80 = vrot.lane.b32.xlu0 %v76_v16, %s514_s27  ;;  %v77_v17 = vcombine.high %v76_v16, %v76_v16  ;;  %v130_v20 = vcombine.high %v129_v18, %v129_v18  ;;  %v547_v23 = vrot.slane %v155_v21, %v75_v15  ;;  %v182_v29 = vstv %s397_s29  ;;  %s565_s8 = sld [smem:[#allocation8]]  ;;  %p486_p2 = scmp.lt.s32.totalorder %s384_s20, %s384_s20 }
  0x34   :  { %v549_v26 = vrot.slane %v229_v24, %v75_v15  ;;  %v285_v27 = vmul.f32 %v284_v25, %v60_v13  ;;  %v183_v30 = vmul.f32 %v182_v29, %v61_v14  ;;  %v312_v31 = vstv %s409_s30  ;;  %s567_s9 = sld [smem:[#allocation8 + $0x3]]  ;;  %p487_p3 = scmp.lt.s32.totalorder %s481_s21, %s481_s21 }
  0x35   :  { %v313_v33 = vmul.f32 %v312_v31, %v61_v14  ;;  %v256_v34 = vstv %s403_s4  ;;  %s569_s10 = sld [smem:[#allocation8 + $0x6]]  ;;  %v164_v56 = vcombine.high %v547_v23, %v547_v23 }
  0x36   :  { %v551_v28 = vrot.slane %v285_v27, %v75_v15  ;;  %v553_v32 = vrot.slane %v183_v30, %v75_v15  ;;  %v257_v36 = vmul.f32 %v256_v34, %v61_v14  ;;  %s571_s11 = sld [smem:[#allocation8 + $0x9]]  ;;  %v170_v47 = vstv %s559_s5  ;;  %p488_p4 = por %p487_p3, %p486_p2 }
  0x37   :  { %104 = vrot.lane.b32.xlu1 %v77_v17, %s513_s26  ;;  %82 = vrot.lane.b32.xlu0 %v77_v17, %s514_s27  ;;  %v555_v35 = vrot.slane %v313_v33, %v75_v15  ;;  %s573_s12 = sld [smem:[#allocation8 + $0xc]]  ;;  %v244_v48 = vstv %s561_s6  ;;  %v238_v57 = vcombine.high %v549_v26, %v549_v26 }
  0x38   :  { %v557_v37 = vrot.slane %v257_v36, %v75_v15  ;;  %s581_s13 = sld [smem:[#allocation8 + $0xf]]  ;;  %v300_v51 = vstv %s563_s7  ;;  %v294_v5 = vcombine.high %v551_v28, %v551_v28  ;;  %v192_v12 = vcombine.high %v553_v32, %v553_v32  ;;  %p489_p5 = pnand %p488_p4, %p482_p1 }
  0x39   :  { %s583_s14 = sld [smem:[#allocation8 + $0xe]]  ;;  %v150_v52 = vstv %s565_s8 }
  0x3a   :  { %s585_s15 = sld [smem:[#allocation8 + $0xb]]  ;;  %v224_v53 = vstv %s567_s9  ;;  %v266_v14 = vcombine.high %v557_v37, %v557_v37 }
  0x3b   :  { %135 = vrot.lane.b32.xlu1 %v130_v20, %s514_s27  ;;  %133 = vrot.lane.b32.xlu0 %v129_v18, %s514_s27  ;;  %s587_s16 = sld [smem:[#allocation8 + $0x11]]  ;;  %v280_v54 = vstv %s569_s10 }
  0x3c   :  { %v176_v59 = vstv %s571_s11 }
  0x3d   :  { %v250_v60 = vstv %s573_s12 }
  0x3e   :  { %v306_v6 = vstv %s581_s13 }
  0x3f   :  { %143 = vrot.lane.b32.xlu1 %v130_v20, %s513_s26  ;;  %141 = vrot.lane.b32.xlu0 %v129_v18, %s513_s26  ;;  %v272_v7 = vstv %s583_s14 }
  0x40   :  { %v198_v8 = vstv %s585_s15 }
  0x41   :  { %v328_v13 = vstv %s587_s16 }
  0xa5   :  { %v103_v43 = vpop.permute.xlu1 %102  ;;  %v81_v44 = vpop.permute.xlu0 %80 }
  0xa9   :  { %v105_v55 = vpop.permute.xlu1 %104  ;;  %v83_v58 = vpop.permute.xlu0 %82 }
  0xaa   :  { %v107_v61 = vsel %vm106_vm0, %v103_v43, %v105_v55  ;;  %v108_v62 = vsel %vm106_vm0, %v105_v55, %v103_v43  ;;  %v87_v63 = vsel %vm86_vm1, %v81_v44, %v83_v58  ;;  %v88_v0 = vsel %vm86_vm1, %v83_v58, %v81_v44 }
  0xab   :  { %v120_v1 = vmul.f32 %v113_v45, %v107_v61  ;;  %v121_v2 = vmul.f32 %v592_v46, %v108_v62  ;;  %v100_v3 = vmul.f32 %v93_v49, %v88_v0  ;;  %v101_v4 = vmul.f32 %v97_v50, %v87_v63 }
  0xad   :  { %v171_v9 = vmul.f32 %v170_v47, %v120_v1  ;;  %v136_v10 = vpop.permute.xlu1 %135  ;;  %v134_v11 = vpop.permute.xlu0 %133  ;;  %v172_v15 = vmul.f32 %v170_v47, %v121_v2  ;;  %v245_v16 = vmul.f32 %v244_v48, %v120_v1  ;;  %v151_v17 = vmul.f32 %v150_v52, %v100_v3 }
  0xae   :  { %v152_v18 = vmul.f32 %v150_v52, %v101_v4  ;;  %v225_v19 = vmul.f32 %v224_v53, %v100_v3  ;;  %v226_v20 = vmul.f32 %v224_v53, %v101_v4  ;;  %v281_v21 = vmul.f32 %v280_v54, %v100_v3 }
  0xaf   :  { %v282_v22 = vmul.f32 %v280_v54, %v101_v4  ;;  %v246_v24 = vmul.f32 %v244_v48, %v121_v2  ;;  %v167_v25 = vadd.f32 %v547_v23, %v151_v17  ;;  %v137_v27 = vsel %vm86_vm1, %v134_v11, %v136_v10 }
  0xb0   :  { %v138_v29 = vsel %vm86_vm1, %v136_v10, %v134_v11  ;;  %v168_v30 = vadd.f32 %v164_v56, %v152_v18  ;;  %v241_v31 = vadd.f32 %v549_v26, %v225_v19  ;;  %v242_v33 = vadd.f32 %v238_v57, %v226_v20 }
  0xb1   :  { %v297_v34 = vadd.f32 %v551_v28, %v281_v21  ;;  %v144_v36 = vpop.permute.xlu1 %143  ;;  %v142_v41 = vpop.permute.xlu0 %141  ;;  %v139_v42 = vmul.f32 %v138_v29, %v93_v49  ;;  %v140_v43 = vmul.f32 %v137_v27, %v97_v50  ;;  %v298_v47 = vadd.f32 %v294_v5, %v282_v22 }
  0xb2   :  { %v145_v44 = vsel %vm106_vm0, %v142_v41, %v144_v36  ;;  %v146_v23 = vsel %vm106_vm0, %v144_v36, %v142_v41  ;;  %v247_v48 = vadd.f32 %v245_v16, %v241_v31  ;;  %v248_v52 = vadd.f32 %v246_v24, %v242_v33  ;;  %v68_v24 = vld [vmem:[#allocation6 + $0x3] ss:$4 sm:$0x3] }
  0xb3   :  { %v147_v53 = vmul.f32 %v145_v44, %v113_v45  ;;  %v178_v54 = vmul.f32 %v176_v59, %v140_v43  ;;  %v251_v55 = vmul.f32 %v250_v60, %v139_v42  ;;  %v252_v26 = vmul.f32 %v250_v60, %v140_v43 }
  0xb4   :  { %v148_v56 = vmul.f32 %v146_v23, %v592_v46  ;;  %v301_v28 = vmul.f32 %v300_v51, %v120_v1  ;;  %v302_v57 = vmul.f32 %v300_v51, %v121_v2  ;;  %v177_v58 = vmul.f32 %v176_v59, %v139_v42 }
  0xb5   :  { %v308_v49 = vmul.f32 %v306_v6, %v140_v43  ;;  %v253_v50 = vadd.f32 %v251_v55, %v247_v48  ;;  %v254_v61 = vadd.f32 %v252_v26, %v248_v52  ;;  %v307_v62 = vmul.f32 %v306_v6, %v139_v42 }
  0xb6   :  { %v174_v63 = vadd.f32 %v172_v15, %v168_v30  ;;  %v273_v0 = vmul.f32 %v272_v7, %v147_v53  ;;  %v173_v3 = vadd.f32 %v171_v9, %v167_v25  ;;  %v304_v4 = vadd.f32 %v302_v57, %v298_v47 }
  0xb7   :  { %v322_v45 = vcombine.high %v555_v35, %v555_v35  ;;  %v274_v5 = vmul.f32 %v272_v7, %v148_v56  ;;  %v200_v60 = vmul.f32 %v198_v8, %v148_v56  ;;  %v303_v11 = vadd.f32 %v301_v28, %v297_v34 }
  0xb8   :  { %v180_v10 = vadd.f32 %v178_v54, %v174_v63  ;;  %v179_v46 = vadd.f32 %v177_v58, %v173_v3  ;;  %v199_v51 = vmul.f32 %v198_v8, %v147_v53  ;;  %v310_v59 = vadd.f32 %v308_v49, %v304_v4 }
  0xb9   :  { %v309_v2 = vadd.f32 %v307_v62, %v303_v11  ;;  %v269_v6 = vadd.f32 %v557_v37, %v253_v50  ;;  %v270_v15 = vadd.f32 %v266_v14, %v254_v61  ;;  %v330_v17 = vmul.f32 %v328_v13, %v148_v56 }
  0xba   :  { %v196_v1 = vadd.f32 %v192_v12, %v180_v10  ;;  %v195_v9 = vadd.f32 %v553_v32, %v179_v46  ;;  %v326_v16 = vadd.f32 %v322_v45, %v310_v59  ;;  %v329_v22 = vmul.f32 %v328_v13, %v147_v53  ;;  %v66_v32 = vld [vmem:[#allocation6 + $0x2] ss:$4 sm:$0x3] }
  0xbb   :  { %v325_v7 = vadd.f32 %v555_v35, %v309_v2  ;;  %v275_v19 = vadd.f32 %v273_v0, %v269_v6  ;;  %v276_v20 = vadd.f32 %v274_v5, %v270_v15  ;;  %v214_v37 = vrot.slane %v66_v32, %v577_v39 }
  0xbc   :  { %v202_v18 = vadd.f32 %v200_v60, %v196_v1  ;;  %v201_v21 = vadd.f32 %v199_v51, %v195_v9  ;;  %v332_v8 = vadd.f32 %v330_v17, %v326_v16  ;;  %v218_v35 = vrot.slane %v66_v32, %v579_v40 }
  0xbd   :  { %v331_v12 = vadd.f32 %v329_v22, %v325_v7  ;;  %v344_v31 = vrot.slane %v68_v24, %v577_v39  ;;  %v348_v33 = vrot.slane %v68_v24, %v579_v40 }
  0xbe   :  { %205 = vrot.lane.b32.xlu1 %v202_v18, %s515_s17  ;;  %203 = vrot.lane.b32.xlu0 %v201_v21, %s515_s17 }
  0xc2   :  { %335 = vrot.lane.b32.xlu1 %v332_v8, %s516_s18  ;;  %333 = vrot.lane.b32.xlu0 %v331_v12, %s516_s18 }
 0x130   :  { %v206_v14 = vpop.permute.xlu1 %205  ;;  %v204_v25 = vpop.permute.xlu0 %203 }
 0x131   :  { %v208_v27 = vsel %vm207_vm2, %v204_v25, %v206_v14  ;;  %v209_v13 = vsel %vm207_vm2, %v206_v14, %v204_v25 }
 0x132   :  { %v221_v29 = vmul.f32 %v214_v37, %v209_v13  ;;  %v222_v30 = vmul.f32 %v218_v35, %v208_v27 }
 0x134   :  { %v336_v34 = vpop.permute.xlu1 %335  ;;  %v334_v36 = vpop.permute.xlu0 %333  ;;  %v277_v43 = vadd.f32 %v275_v19, %v221_v29  ;;  %v278_v44 = vadd.f32 %v276_v20, %v222_v30 }
 0x135   :  { %v338_v41 = vsel %vm337_vm3, %v334_v36, %v336_v34  ;;  %v339_v42 = vsel %vm337_vm3, %v336_v34, %v334_v36 }
 0x136   :  { %v351_v23 = vmul.f32 %v344_v31, %v338_v41  ;;  %v352_v47 = vmul.f32 %v348_v33, %v339_v42 }
 0x138   :  { %v353_v48 = vadd.f32 %v351_v23, %v277_v43  ;;  %v354_v52 = vadd.f32 %v352_v47, %v278_v44 }
 0x13a   :  { %v355_v53 = vsub.f32 0.0, %v353_v48  ;;  %v356_v54 = vsub.f32 0.0, %v354_v52 }
 0x13c   :  { %v357_v55 = vmul.f32 1.442695, %v355_v53  ;;  %v359_v38 = vmul.f32 1.442695, %v356_v54 }
 0x13e   :  { %421 = vpow2.f32 %v357_v55 }
 0x13f   :  { %423 = vpow2.f32 %v359_v38 }
 0x14b   :  { %v422_v26 = vpop.eup %421 }
 0x14c   :  { %v424_v39 = vpop.eup %423  ;;  %v361_v56 = vadd.f32 1.0, %v422_v26 }
 0x14d   :  { %v362_v40 = vadd.f32 1.0, %v424_v39 }
 0x14e   :  { %425 = vrcp.f32 %v361_v56 }
 0x14f   :  { %427 = vrcp.f32 %v362_v40 }
 0x15b   :  { %v426_v28 = vpop.eup %425 }
 0x15c   :  { %v428_v57 = vpop.eup %427 }
 0x15d   :  { %v367_v58 = vcombine.low %v426_v28, %v428_v57 }
 0x15f   :  { %411 = vst.sshfl [vmem:[#allocation9] sm:$0x33 pattern:$0x76325410] %v367_v58 }
 0x160   :  { %492 = shalt.err (!%p489_p5)
}
 0x161   :  { %386 = dma.vmem_to_hbm [thread:$0]  %s384_s20, 64, %s661_s3, [#allocation4]  }
 0x162   :  { %507 = dma.done.wait [#allocation4], 64  }
 0x163   :  { %508 = vsyncadd [#allocation4], 4294967232 }
 0x164   :  { %390 = vsyncpa [#allocation3], 1 }
 0x165   :  { %391 = vsyncpa [#allocation7], 1 }
 0x166   :  { %392 = vsyncpa [#allocation4], 1 }
 0x167   :  { %393 = vsyncpa [#allocation5], 1 }

</bundles_post_ra>
